<compile_context>
chip_gen: v5e
topology: v5e:2x2
jax: 0.10.0
libtpu: 0.0.40
codegen_flags: <defaults>
</compile_context>

<pallas_src>
from functools import partial

import numpy as np
import jax
import jax.numpy as jnp
from jax.experimental import pallas as pl
from jax.experimental.pallas import tpu as pltpu


def _mixconv_channels(out_ch, k):
    """'equal_params' channel split from MixConv2d.__init__ (default method)."""
    groups = len(k)
    b = [out_ch] + [0] * groups
    a = np.eye(groups + 1, groups, k=-1)
    a -= np.roll(a, 1, axis=1)
    a *= np.array(k) ** 2
    a[0] = 1
    ch = np.linalg.lstsq(a, b, rcond=None)[0].round().astype(int)
    return [int(c) for c in ch]


def _mixconv_banded_kernel(x_ref, w_ref, b_ref, o_ref, xs_ref, *, kmax, TH):
    """One output row tile of the fused MixConv2d.

    x_ref : (H, W*Cin)            full (unpadded) image of batch n, lane-flattened
    w_ref : (kmax, W*Cin, W*Cout) banded weights (dw offsets + W zero pad folded in)
    b_ref : (1, W*Cout)           bias tiled across w (f32)
    o_ref : (TH, W*Cout)          lane-dense output row tile
    xs_ref: (TH + 2*mp, W*Cin)    scratch: haloed row window (zeros outside image)
    """
    mp = (kmax - 1) // 2
    r = pl.program_id(1)
    nrt = pl.num_programs(1)
    h0 = pl.multiple_of(r * TH, TH)
    wcin = x_ref.shape[-1]

    # ---- haloed row window: one lane-dense copy; H zero-pad handled here ----
    xs_ref[mp:mp + TH, :] = x_ref[pl.ds(h0, TH), :]
    if mp > 0:
        @pl.when(r > 0)
        def _():
            xs_ref[0:mp, :] = x_ref[pl.ds(h0 - mp, mp), :]

        @pl.when(r == 0)
        def _():
            xs_ref[0:mp, :] = jnp.zeros((mp, wcin), xs_ref.dtype)

        @pl.when(r < nrt - 1)
        def _():
            xs_ref[mp + TH:2 * mp + TH, :] = x_ref[pl.ds(h0 + TH, mp), :]

        @pl.when(r == nrt - 1)
        def _():
            xs_ref[mp + TH:2 * mp + TH, :] = jnp.zeros((mp, wcin), xs_ref.dtype)

    # ---- kmax accumulated MXU matmuls, f32 accumulation; no im2col at all ----
    acc = jnp.dot(xs_ref[0:TH, :], w_ref[0], preferred_element_type=jnp.float32)
    for dh in range(1, kmax):
        acc = acc + jnp.dot(xs_ref[dh:dh + TH, :], w_ref[dh],
                            preferred_element_type=jnp.float32)
    acc = acc + b_ref[...].astype(jnp.float32)
    o_ref[...] = acc.astype(o_ref.dtype)


def _pick_row_tile(H, wcin, wcout, kmax, itemsize, budget=8 << 20):
    """Largest row tile (multiple of 8 dividing H, or H itself) whose per-tile
    footprint (double-buffered out block + halo window + f32 accumulator) fits
    `budget` bytes."""
    mp = (kmax - 1) // 2
    cands = sorted({H, *[t for t in range(8, H, 8) if H % t == 0]})

    def cost(t):
        return (2 * t * wcout * itemsize          # out block (double buffered)
                + (t + 2 * mp) * wcin * itemsize  # halo scratch
                + t * wcout * 4)                  # f32 accumulator

    fitting = [t for t in cands if cost(t) <= budget]
    return max(fitting) if fitting else min(cands)


def mixconv_forward(x_flat, w_banded, bias_flat, *, kmax, W, cout, row_tile=None):
    """Fused MixConv2d forward.

    x_flat   : (N, H, W*Cin)           lane-flattened NHWC activations (no pad)
    w_banded : (kmax, W*Cin, W*Cout)   banded per-row-offset weights
    bias_flat: (1, W*Cout)             f32 bias, tiled across w
    returns  : (N, H, W*Cout)          lane-flattened NHWC output
    """
    N, H, wcin = x_flat.shape
    wcout = W * cout
    mp = (kmax - 1) // 2
    itemsize = x_flat.dtype.itemsize

    TH = row_tile if row_tile is not None else _pick_row_tile(H, wcin, wcout, kmax, itemsize)
    assert H % TH == 0 and (TH == H or TH % 8 == 0), (H, TH)
    nrt = H // TH
    # NOTE: last out dim is the full W*Cout (always layout-legal); it is a
    # multiple of 128 here so stores are unmasked/lane-dense.

    # Explicit VMEM budget (image + weights are resident, pipeline double-buffers).
    need = (2 * H * wcin * itemsize
            + 2 * kmax * wcin * wcout * w_banded.dtype.itemsize
            + 2 * wcout * 4
            + 2 * TH * wcout * itemsize
            + (TH + 2 * mp) * wcin * itemsize
            + TH * wcout * 4)
    vmem_limit = int(min(max(2 * need, 32 << 20), 48 << 20))

    kern = partial(_mixconv_banded_kernel, kmax=kmax, TH=TH)
    out = pl.pallas_call(
        kern,
        out_shape=jax.ShapeDtypeStruct((N, H, wcout), x_flat.dtype),
        grid_spec=pltpu.PrefetchScalarGridSpec(
            num_scalar_prefetch=0,
            grid=(N, nrt),
            in_specs=[
                # Full (unpadded) image of batch n; constant in r -> DMA'd once
                # per batch element, reused across its row tiles.
                pl.BlockSpec((None, H, wcin), lambda n, r: (n, 0, 0)),
                pl.BlockSpec((kmax, wcin, wcout), lambda n, r: (0, 0, 0)),  # resident
                pl.BlockSpec((1, wcout), lambda n, r: (0, 0)),              # resident
            ],
            out_specs=pl.BlockSpec((None, TH, wcout), lambda n, r: (n, r, 0)),
            scratch_shapes=[pltpu.VMEM((TH + 2 * mp, wcin), x_flat.dtype)],
        ),
        compiler_params=pltpu.CompilerParams(
            # Megacore splits on the batch axis only: row tiles of one image are
            # sequential so the resident image block is not duplicated per core.
            dimension_semantics=("parallel", "arbitrary"),
            vmem_limit_bytes=vmem_limit),
    )(x_flat, w_banded, bias_flat)
    return out


class MixConv2dPallas:
    """JAX/Pallas port of MixConv2d (stride=1, dilation=1, bias=True)."""

    def __init__(self, in_ch, out_ch, k=(3, 5, 7), *, key, row_tile=None):
        self.in_ch = in_ch
        self.k = tuple(k)
        self.kmax = max(self.k)
        self.ch = _mixconv_channels(out_ch, self.k)
        self.cout = int(sum(self.ch))
        self.row_tile = row_tile

        # Per-branch parameters (HWIO), PyTorch Conv2d default init.
        self.params = []
        keys = jax.random.split(key, 2 * len(self.k))
        for g, kg in enumerate(self.k):
            fan_in = in_ch * kg * kg
            bound = 1.0 / float(np.sqrt(fan_in))
            w = jax.random.uniform(keys[2 * g], (kg, kg, in_ch, self.ch[g]),
                                   jnp.float32, -bound, bound)
            b = jax.random.uniform(keys[2 * g + 1], (self.ch[g],),
                                   jnp.float32, -bound, bound)
            self.params.append((w, b))
        self.bias = np.concatenate([np.asarray(b) for _, b in self.params])  # (Cout,)
        self._banded_cache = {}   # (W, dtype) -> (A, bias_flat)

    def _banded_weight(self, W, dtype):
        """Build (and cache) the banded weight A[dh] : (W*Cin, W*Cout).

        A[dh, w_in*Cin + c, w*Cout + (c0_g + o)] = w_g[dh-off_g, w_in-w+pg, c, o]
        for every branch g and valid tap; entries for out-of-image w_in simply do
        not exist, which reproduces the Conv2d zero padding along W.
        """
        key = (W, jnp.dtype(dtype).name)
        if key in self._banded_cache:
            return self._banded_cache[key]
        cin, cout, kmax = self.in_ch, self.cout, self.kmax
        mp = (kmax - 1) // 2
        A = np.zeros((kmax, W * cin, W * cout), np.float32)
        c0 = 0
        for (wg, _), kg in zip(self.params, self.k):
            wnp = np.asarray(wg)                      # (kg, kg, cin, chg)
            chg = wnp.shape[-1]
            pg = (kg - 1) // 2
            off = mp - pg
            for i in range(kg):
                dh = i + off
                for j in range(kg):
                    dwo = j - pg
                    for w in range(W):
                        wi = w + dwo
                        if 0 <= wi < W:
                            A[dh, wi * cin:(wi + 1) * cin,
                              w * cout + c0: w * cout + c0 + chg] = wnp[i, j]
            c0 += chg
        A = jnp.asarray(A, dtype)
        bias_flat = jnp.asarray(np.tile(self.bias.astype(np.float32), W).reshape(1, W * cout))
        self._banded_cache[key] = (A, bias_flat)
        return A, bias_flat

    def __call__(self, x_nchw):
        N, C, H, W = x_nchw.shape
        assert C == self.in_ch
        # NCHW -> lane-flattened NHWC (N, H, W*Cin); no jnp.pad anywhere.
        x = jnp.transpose(x_nchw, (0, 2, 3, 1)).reshape(N, H, W * C)
        A, bflat = self._banded_weight(W, x.dtype)
        y = mixconv_forward(x, A, bflat, kmax=self.kmax, W=W, cout=self.cout,
                            row_tile=self.row_tile)
        return jnp.transpose(y.reshape(N, H, W, self.cout), (0, 3, 1, 2))


def _reference(x_nchw, mod):
    """Pure-JAX reference (lax.conv per branch + concat) for verification."""
    x = jnp.transpose(x_nchw, (0, 2, 3, 1))
    outs = []
    for (w, b), kg in zip(mod.params, mod.k):
        pg = (kg - 1) // 2
        y = jax.lax.conv_general_dilated(
            x, w, window_strides=(1, 1), padding=[(pg, pg), (pg, pg)],
            dimension_numbers=("NHWC", "HWIO", "NHWC"))
        outs.append(y + b[None, None, None, :])
    y = jnp.concatenate(outs, axis=-1)
    return jnp.transpose(y, (0, 3, 1, 2))


if __name__ == "__main__":
    key = jax.random.PRNGKey(0)
    kx, kp = jax.random.split(key)

    N, Cin, H, W = 2, 4, 16, 16
    out_ch = 16  # equal_params split for k=(3,5,7): [10, 4, 2]

    x = jax.random.normal(kx, (N, Cin, H, W), jnp.float32)
    mod = MixConv2dPallas(Cin, out_ch, k=(3, 5, 7), key=kp)

    y_ref = jax.block_until_ready(_reference(x, mod))

    # Default row tile (TH == H, single tile per image).
    y1 = jax.block_until_ready(mod(x))
    assert y1.shape == (N, out_ch, H, W), y1.shape
    np.testing.assert_allclose(np.asarray(y1), np.asarray(y_ref), rtol=2e-4, atol=2e-4)

    # Explicit row_tile=8: exercises the multi-tile pipelined path and the
    # in-kernel top/bottom halo handling (boundary + interior tiles).
    mod.row_tile = 8
    y2 = jax.block_until_ready(mod(x))
    np.testing.assert_allclose(np.asarray(y2), np.asarray(y_ref), rtol=2e-4, atol=2e-4)

    # bf16 activations (banded weight cast once and cached): MXU bf16, f32 accum.
    y3 = jax.block_until_ready(mod(x.astype(jnp.bfloat16)))
    np.testing.assert_allclose(np.asarray(y3.astype(jnp.float32)), np.asarray(y_ref),
                               rtol=1e-1, atol=1e-1)

    print("KERNEL_OK")
</pallas_src>

<mosaic_0001>
module attributes {stable_mosaic.version = 11 : i64} {
  func.func @_mixconv_banded_kernel(%arg0: i32, %arg1: i32, %arg2: memref<1x16x64xf32, #tpu.memory_space<vmem>>, %arg3: memref<7x64x256xf32, #tpu.memory_space<vmem>>, %arg4: memref<1x256xf32, #tpu.memory_space<vmem>>, %arg5: memref<1x16x256xf32, #tpu.memory_space<vmem>>, %arg6: memref<22x64xf32, #tpu.memory_space<vmem>>) attributes {dimension_semantics = [#tpu.dimension_semantics<parallel>, #tpu.dimension_semantics<arbitrary>], iteration_bounds = array<i64: 2, 1>, scalar_prefetch = 0 : i64, scratch_operands = 1 : i64, tpu.core_type = #tpu.core_type<tc>, window_params = [{transform_indices = @transform_0, window_bounds = array<i64: 1, 16, 64>}, {pipeline_mode = #tpu.pipeline_mode<synchronous>, transform_indices = @transform_1, window_bounds = array<i64: 7, 64, 256>}, {pipeline_mode = #tpu.pipeline_mode<synchronous>, transform_indices = @transform_2, window_bounds = array<i64: 1, 256>}, {transform_indices = @transform_3, window_bounds = array<i64: 1, 16, 256>}]} {
    %c16_i32 = arith.constant 16 : i32
    %0 = arith.muli %arg1, %c16_i32 : i32
    %1 = tpu.assume_multiple %0, 16 : i32
    %c0 = arith.constant 0 : index
    %2 = arith.index_cast %1 : i32 to index
    %c0_0 = arith.constant 0 : index
    %3 = vector.load %arg2[%c0, %2, %c0_0] : memref<1x16x64xf32, #tpu.memory_space<vmem>>, vector<1x16x64xf32>
    %4 = vector.shape_cast %3 : vector<1x16x64xf32> to vector<16x64xf32>
    %c3 = arith.constant 3 : index
    %c0_1 = arith.constant 0 : index
    %5 = vector.load %arg6[%c3, %c0_1] : memref<22x64xf32, #tpu.memory_space<vmem>>, vector<16x64xf32>
    tpu.vector_store %arg6[%c3, %c0_1], %4 {strides = array<i32>} : memref<22x64xf32, #tpu.memory_space<vmem>>, vector<16x64xf32>,
    %c0_i32 = arith.constant 0 : i32
    %6 = arith.cmpi sgt, %arg1, %c0_i32 : i32
    %7 = arith.extui %6 : i1 to i32
    %c0_i32_2 = arith.constant 0 : i32
    %8 = arith.cmpi ne, %7, %c0_i32_2 : i32
    scf.if %8 {
      %c3_i32 = arith.constant 3 : i32
      %58 = arith.subi %1, %c3_i32 : i32
      %c0_50 = arith.constant 0 : index
      %59 = arith.index_cast %58 : i32 to index
      %c0_51 = arith.constant 0 : index
      %60 = vector.load %arg2[%c0_50, %59, %c0_51] : memref<1x16x64xf32, #tpu.memory_space<vmem>>, vector<1x3x64xf32>
      %61 = vector.shape_cast %60 : vector<1x3x64xf32> to vector<3x64xf32>
      %c0_52 = arith.constant 0 : index
      %c0_53 = arith.constant 0 : index
      %62 = vector.load %arg6[%c0_52, %c0_53] : memref<22x64xf32, #tpu.memory_space<vmem>>, vector<3x64xf32>
      tpu.vector_store %arg6[%c0_52, %c0_53], %61 {strides = array<i32>} : memref<22x64xf32, #tpu.memory_space<vmem>>, vector<3x64xf32>,
    } else {
    }
    %c0_i32_3 = arith.constant 0 : i32
    %9 = arith.cmpi eq, %arg1, %c0_i32_3 : i32
    %10 = arith.extui %9 : i1 to i32
    %c0_i32_4 = arith.constant 0 : i32
    %11 = arith.cmpi ne, %10, %c0_i32_4 : i32
    scf.if %11 {
      %cst_50 = arith.constant 0.000000e+00 : f32
      %58 = vector.broadcast %cst_50 : f32 to vector<3x64xf32>
      %c0_51 = arith.constant 0 : index
      %c0_52 = arith.constant 0 : index
      %59 = vector.load %arg6[%c0_51, %c0_52] : memref<22x64xf32, #tpu.memory_space<vmem>>, vector<3x64xf32>
      tpu.vector_store %arg6[%c0_51, %c0_52], %58 {strides = array<i32>} : memref<22x64xf32, #tpu.memory_space<vmem>>, vector<3x64xf32>,
    } else {
    }
    %c0_i32_5 = arith.constant 0 : i32
    %12 = arith.cmpi slt, %arg1, %c0_i32_5 : i32
    %13 = arith.extui %12 : i1 to i32
    %c0_i32_6 = arith.constant 0 : i32
    %14 = arith.cmpi ne, %13, %c0_i32_6 : i32
    scf.if %14 {
      %c16_i32_50 = arith.constant 16 : i32
      %58 = arith.addi %1, %c16_i32_50 : i32
      %c0_51 = arith.constant 0 : index
      %59 = arith.index_cast %58 : i32 to index
      %c0_52 = arith.constant 0 : index
      %60 = vector.load %arg2[%c0_51, %59, %c0_52] : memref<1x16x64xf32, #tpu.memory_space<vmem>>, vector<1x3x64xf32>
      %61 = vector.shape_cast %60 : vector<1x3x64xf32> to vector<3x64xf32>
      %c19 = arith.constant 19 : index
      %c0_53 = arith.constant 0 : index
      %62 = vector.load %arg6[%c19, %c0_53] : memref<22x64xf32, #tpu.memory_space<vmem>>, vector<3x64xf32>
      tpu.vector_store %arg6[%c19, %c0_53], %61 {strides = array<i32>} : memref<22x64xf32, #tpu.memory_space<vmem>>, vector<3x64xf32>,
    } else {
    }
    %c0_i32_7 = arith.constant 0 : i32
    %15 = arith.cmpi eq, %arg1, %c0_i32_7 : i32
    %16 = arith.extui %15 : i1 to i32
    %c0_i32_8 = arith.constant 0 : i32
    %17 = arith.cmpi ne, %16, %c0_i32_8 : i32
    scf.if %17 {
      %cst_50 = arith.constant 0.000000e+00 : f32
      %58 = vector.broadcast %cst_50 : f32 to vector<3x64xf32>
      %c19 = arith.constant 19 : index
      %c0_51 = arith.constant 0 : index
      %59 = vector.load %arg6[%c19, %c0_51] : memref<22x64xf32, #tpu.memory_space<vmem>>, vector<3x64xf32>
      tpu.vector_store %arg6[%c19, %c0_51], %58 {strides = array<i32>} : memref<22x64xf32, #tpu.memory_space<vmem>>, vector<3x64xf32>,
    } else {
    }
    %c0_9 = arith.constant 0 : index
    %c0_10 = arith.constant 0 : index
    %18 = vector.load %arg6[%c0_9, %c0_10] : memref<22x64xf32, #tpu.memory_space<vmem>>, vector<16x64xf32>
    %c0_11 = arith.constant 0 : index
    %c0_12 = arith.constant 0 : index
    %c0_13 = arith.constant 0 : index
    %19 = vector.load %arg3[%c0_11, %c0_12, %c0_13] : memref<7x64x256xf32, #tpu.memory_space<vmem>>, vector<1x64x256xf32>
    %20 = vector.shape_cast %19 : vector<1x64x256xf32> to vector<64x256xf32>
    %cst = arith.constant dense<0.000000e+00> : vector<16x256xf32>
    %21 = tpu.matmul %18, %20, %cst {dimension_numbers = #tpu.dot_dimension_numbers<[1], [0], [0], [1], [0, 0, 1, 1], [], []>} : vector<16x64xf32>, vector<64x256xf32>, vector<16x256xf32> -> vector<16x256xf32>
    %c1 = arith.constant 1 : index
    %c0_14 = arith.constant 0 : index
    %22 = vector.load %arg6[%c1, %c0_14] : memref<22x64xf32, #tpu.memory_space<vmem>>, vector<16x64xf32>
    %c1_15 = arith.constant 1 : index
    %c0_16 = arith.constant 0 : index
    %c0_17 = arith.constant 0 : index
    %23 = vector.load %arg3[%c1_15, %c0_16, %c0_17] : memref<7x64x256xf32, #tpu.memory_space<vmem>>, vector<1x64x256xf32>
    %24 = vector.shape_cast %23 : vector<1x64x256xf32> to vector<64x256xf32>
    %cst_18 = arith.constant dense<0.000000e+00> : vector<16x256xf32>
    %25 = tpu.matmul %22, %24, %cst_18 {dimension_numbers = #tpu.dot_dimension_numbers<[1], [0], [0], [1], [0, 0, 1, 1], [], []>} : vector<16x64xf32>, vector<64x256xf32>, vector<16x256xf32> -> vector<16x256xf32>
    %26 = arith.addf %21, %25 : vector<16x256xf32>
    %c2 = arith.constant 2 : index
    %c0_19 = arith.constant 0 : index
    %27 = vector.load %arg6[%c2, %c0_19] : memref<22x64xf32, #tpu.memory_space<vmem>>, vector<16x64xf32>
    %c2_20 = arith.constant 2 : index
    %c0_21 = arith.constant 0 : index
    %c0_22 = arith.constant 0 : index
    %28 = vector.load %arg3[%c2_20, %c0_21, %c0_22] : memref<7x64x256xf32, #tpu.memory_space<vmem>>, vector<1x64x256xf32>
    %29 = vector.shape_cast %28 : vector<1x64x256xf32> to vector<64x256xf32>
    %cst_23 = arith.constant dense<0.000000e+00> : vector<16x256xf32>
    %30 = tpu.matmul %27, %29, %cst_23 {dimension_numbers = #tpu.dot_dimension_numbers<[1], [0], [0], [1], [0, 0, 1, 1], [], []>} : vector<16x64xf32>, vector<64x256xf32>, vector<16x256xf32> -> vector<16x256xf32>
    %31 = arith.addf %26, %30 : vector<16x256xf32>
    %c3_24 = arith.constant 3 : index
    %c0_25 = arith.constant 0 : index
    %32 = vector.load %arg6[%c3_24, %c0_25] : memref<22x64xf32, #tpu.memory_space<vmem>>, vector<16x64xf32>
    %c3_26 = arith.constant 3 : index
    %c0_27 = arith.constant 0 : index
    %c0_28 = arith.constant 0 : index
    %33 = vector.load %arg3[%c3_26, %c0_27, %c0_28] : memref<7x64x256xf32, #tpu.memory_space<vmem>>, vector<1x64x256xf32>
    %34 = vector.shape_cast %33 : vector<1x64x256xf32> to vector<64x256xf32>
    %cst_29 = arith.constant dense<0.000000e+00> : vector<16x256xf32>
    %35 = tpu.matmul %32, %34, %cst_29 {dimension_numbers = #tpu.dot_dimension_numbers<[1], [0], [0], [1], [0, 0, 1, 1], [], []>} : vector<16x64xf32>, vector<64x256xf32>, vector<16x256xf32> -> vector<16x256xf32>
    %36 = arith.addf %31, %35 : vector<16x256xf32>
    %c4 = arith.constant 4 : index
    %c0_30 = arith.constant 0 : index
    %37 = vector.load %arg6[%c4, %c0_30] : memref<22x64xf32, #tpu.memory_space<vmem>>, vector<16x64xf32>
    %c4_31 = arith.constant 4 : index
    %c0_32 = arith.constant 0 : index
    %c0_33 = arith.constant 0 : index
    %38 = vector.load %arg3[%c4_31, %c0_32, %c0_33] : memref<7x64x256xf32, #tpu.memory_space<vmem>>, vector<1x64x256xf32>
    %39 = vector.shape_cast %38 : vector<1x64x256xf32> to vector<64x256xf32>
    %cst_34 = arith.constant dense<0.000000e+00> : vector<16x256xf32>
    %40 = tpu.matmul %37, %39, %cst_34 {dimension_numbers = #tpu.dot_dimension_numbers<[1], [0], [0], [1], [0, 0, 1, 1], [], []>} : vector<16x64xf32>, vector<64x256xf32>, vector<16x256xf32> -> vector<16x256xf32>
    %41 = arith.addf %36, %40 : vector<16x256xf32>
    %c5 = arith.constant 5 : index
    %c0_35 = arith.constant 0 : index
    %42 = vector.load %arg6[%c5, %c0_35] : memref<22x64xf32, #tpu.memory_space<vmem>>, vector<16x64xf32>
    %c5_36 = arith.constant 5 : index
    %c0_37 = arith.constant 0 : index
    %c0_38 = arith.constant 0 : index
    %43 = vector.load %arg3[%c5_36, %c0_37, %c0_38] : memref<7x64x256xf32, #tpu.memory_space<vmem>>, vector<1x64x256xf32>
    %44 = vector.shape_cast %43 : vector<1x64x256xf32> to vector<64x256xf32>
    %cst_39 = arith.constant dense<0.000000e+00> : vector<16x256xf32>
    %45 = tpu.matmul %42, %44, %cst_39 {dimension_numbers = #tpu.dot_dimension_numbers<[1], [0], [0], [1], [0, 0, 1, 1], [], []>} : vector<16x64xf32>, vector<64x256xf32>, vector<16x256xf32> -> vector<16x256xf32>
    %46 = arith.addf %41, %45 : vector<16x256xf32>
    %c6 = arith.constant 6 : index
    %c0_40 = arith.constant 0 : index
    %47 = vector.load %arg6[%c6, %c0_40] : memref<22x64xf32, #tpu.memory_space<vmem>>, vector<16x64xf32>
    %c6_41 = arith.constant 6 : index
    %c0_42 = arith.constant 0 : index
    %c0_43 = arith.constant 0 : index
    %48 = vector.load %arg3[%c6_41, %c0_42, %c0_43] : memref<7x64x256xf32, #tpu.memory_space<vmem>>, vector<1x64x256xf32>
    %49 = vector.shape_cast %48 : vector<1x64x256xf32> to vector<64x256xf32>
    %cst_44 = arith.constant dense<0.000000e+00> : vector<16x256xf32>
    %50 = tpu.matmul %47, %49, %cst_44 {dimension_numbers = #tpu.dot_dimension_numbers<[1], [0], [0], [1], [0, 0, 1, 1], [], []>} : vector<16x64xf32>, vector<64x256xf32>, vector<16x256xf32> -> vector<16x256xf32>
    %51 = arith.addf %46, %50 : vector<16x256xf32>
    %c0_45 = arith.constant 0 : index
    %c0_46 = arith.constant 0 : index
    %52 = vector.load %arg4[%c0_45, %c0_46] : memref<1x256xf32, #tpu.memory_space<vmem>>, vector<1x256xf32>
    %53 = vector.broadcast %52 : vector<1x256xf32> to vector<16x256xf32>
    %54 = arith.addf %51, %53 : vector<16x256xf32>
    %c0_47 = arith.constant 0 : index
    %c0_48 = arith.constant 0 : index
    %c0_49 = arith.constant 0 : index
    %55 = vector.load %arg5[%c0_47, %c0_48, %c0_49] : memref<1x16x256xf32, #tpu.memory_space<vmem>>, vector<1x16x256xf32>
    %56 = vector.shape_cast %55 : vector<1x16x256xf32> to vector<16x256xf32>
    %57 = vector.shape_cast %54 : vector<16x256xf32> to vector<1x16x256xf32>
    tpu.vector_store %arg5[%c0_47, %c0_48, %c0_49], %57 {strides = array<i32>} : memref<1x16x256xf32, #tpu.memory_space<vmem>>, vector<1x16x256xf32>,
    return
  }
  func.func @transform_0(%arg0: i32, %arg1: i32) -> (i32, i32, i32) {
    %c0_i32 = arith.constant 0 : i32
    %c0_i32_0 = arith.constant 0 : i32
    %c0_i32_1 = arith.constant 0 : i32
    return %arg0, %c0_i32, %c0_i32_0 : i32, i32, i32
  }
  func.func @transform_1(%arg0: i32, %arg1: i32) -> (i32, i32, i32) {
    %c0_i32 = arith.constant 0 : i32
    %c0_i32_0 = arith.constant 0 : i32
    %c0_i32_1 = arith.constant 0 : i32
    %c0_i32_2 = arith.constant 0 : i32
    return %c0_i32, %c0_i32_0, %c0_i32_1 : i32, i32, i32
  }
  func.func @transform_2(%arg0: i32, %arg1: i32) -> (i32, i32) {
    %c0_i32 = arith.constant 0 : i32
    %c0_i32_0 = arith.constant 0 : i32
    %c0_i32_1 = arith.constant 0 : i32
    return %c0_i32, %c0_i32_0 : i32, i32
  }
  func.func @transform_3(%arg0: i32, %arg1: i32) -> (i32, i32, i32) {
    %c0_i32 = arith.constant 0 : i32
    %c0_i32_0 = arith.constant 0 : i32
    return %arg0, %arg1, %c0_i32 : i32, i32, i32
  }
}

</mosaic_0001>

<bundles_post_ra>
// kernel: tpu_custom_call.1
= control target key start
LH: loop header
LB: loop body
LE: loop exit
PB: predicated region body
PF: predicated region fallthrough
CT: control target
= control target key end

     0   :  { %s1484_s0 = inlined_call_operand.hbm [shape: f32[2,16,64], index: 0, kind: input, shape index: {}]   ;;  %s1485_s1 = inlined_call_operand.hbm [shape: f32[7,64,256], index: 1, kind: input, shape index: {}]   ;;  %s1486_s2 = inlined_call_operand.hbm [shape: f32[1,256], index: 2, kind: input, shape index: {}]   ;;  %s1487_s3 = inlined_call_operand.hbm [shape: f32[2,16,256], index: 3, kind: output, shape index: {}]  }
   0x1   :  { %1488 = sst [smem:[#allocation13_spill]] %s1485_s1 }
   0x2   :  { %8 = vsyncpa [#allocation4], 0 }
   0x3   :  { %10 = vsyncpa [#allocation4 + $0x1], 0 }
   0x4   :  { %11 = vsyncpa [#allocation7], 0 }
   0x5   :  { %12 = vsyncpa [#allocation5], 0 }
   0x6   :  { %14 = vsyncpa [#allocation5 + $0x1], 0  ;;  %s1295_s12 = smov 0   ;;  %s1297_s13 = smov 0  }
   0x7   :  { %s1299_s14 = smov 0   ;;  %s1301_s15 = smov 0  }
   0x8   :  { %s1303_s16 = smov 0   ;;  %s1305_s17 = smov 0  }
   0x9 LB: > { %s931_s18 = sadd.s32 4294967295, %s1264_s17   ;;  %s932_s19 = sadd.s32 4294967294, %s1264_s17   ;;  %s1264_s17 = sphi %s1305_s17, %s20_s17   ;;  %s1260_s16 = sphi %s1303_s16, %s1501_s16   ;;  %s1256_s15 = sphi %s1301_s15, %s1500_s15   ;;  %s1252_s14 = sphi %s1299_s14, %s1499_s14   ;;  %s1248_s13 = sphi %s1297_s13, %s1498_s13   ;;  %s1244_s12 = sphi %s1295_s12, %s1497_s12  }
   0xa   : > { %p52_p0 = scmp.ne.s32.totalorder %s1248_s13, %s1244_s12  ;;  %p1329_p1 = scmp.eq.s32.totalorder %s931_s18, 0 }
   0xb   : > { %p1333_p2 = scmp.eq.s32.totalorder %s931_s18, 1  ;;  %p126_p3 = scmp.eq.s32.totalorder %s932_s19, 1 }
   0xc   : > { %p1339_p4 = por %p1329_p1, %p52_p0  ;;  %p933_p5 = scmp.ge.s32.totalorder %s1264_s17, 1 }
   0xd   : > { %p1344_p6 = por %p126_p3, %p52_p0  ;;  %p133_p7 = scmp.lt.s32.totalorder %s1264_s17, 3 }
   0xe   : > { %s1493_s1 = sld [smem:[#allocation13_spill]]  ;;  %s1266_s28 = smov [#allocation6]  }
   0xf   : > { %p1352_p8 = pnand %p933_p5, %p133_p7  ;;  %s146_s29 = sshll.u32 %s1266_s28, 4  ;;  %s147_s29 = int_to_ptr.vmem [resolvable:$true] %s146_s29 }
  0x10   : > { %p936_p11 = scmp.ge.s32.totalorder %s1264_s17, 2  ;;  %s159_s5 = sshll.u32 %s1486_s2, 4  ;;  %s160_s5 = int_to_ptr.hbm [resolvable:$true] %s159_s5 }
  0x11   : > { %p1010_p9 = pneg %p1352_p8  ;;  %s1267_s6 = smov 256  }
  0x12   : > { %s1268_s7 = smov 16   ;;  %s1269_s8 = smov [#allocation8]  }
  0x13   : > { %p1011_p10 = pnand %p1010_p9, %p1329_p1  ;;  %s161_s9 = sshll.u32 %s1269_s8, 4  ;;  %s162_s9 = int_to_ptr.vmem [resolvable:$true] %s161_s9 }
  0x14   : > { %s144_s26 = sshll.u32 %s1493_s1, 4  ;;  %s32_s10 = sadd.s32 1, %s1260_s16  ;;  %s145_s26 = int_to_ptr.hbm [resolvable:$true] %s144_s26 }
  0x15   : > { %1013 = dma.hbm_to_vmem [thread:$0]  (!%p1011_p10), %s145_s26, 14336, %s147_s29, [#allocation7], %s1267_s6, %s1267_s6, %s1268_s7  }
  0x16   : > { %1016 = dma.hbm_to_vmem [thread:$0]  (!%p1011_p10), %s160_s5, 32, %s162_s9, [#allocation7]  }
  0x17   : > { %s39_s11 = sadd.s32 1, %s1252_s14  ;;  %p34_p12 = scmp.ge.s32.totalorder %s32_s10, 2 }
  0x18   : > { %p46_p13 = scmp.ne.s32.totalorder %s1252_s14, %s1248_s13  ;;  %p47_p0 = scmp.eq.s32.totalorder %s1264_s17, 0 }
  0x19   : > { %p1027_p3 = scmp.lt.s32.totalorder %s1264_s17, 2  ;;  %s1503_s10 = smov (%p34_p12, %s32_s10), 0 }
  0x1a   : > { %p1372_p5 = por %p47_p0, %p46_p13  ;;  %p1378_p7 = por %p1333_p2, %p46_p13 }
  0x1b   : > { %s36_s24 = ssub.s32 %s1260_s16, %s1503_s10  ;;  %s172_s25 = sand.u32 1, %s1252_s14  }
  0x1c   : > { %p37_p9 = scmp.eq.s32.totalorder %s36_s24, 0  ;;  %s937_s26 = sshll.u32 %s172_s25, 4 }
  0x1d   : > { %s980_s28 = sshll.u32 %s1260_s16, 4  ;;  %s176_s7 = scalar_lea.vmem [#allocation3], %s937_s26 }
  0x1e   : > { %s1387_s29 = scalar_select %p37_p9, %s1252_s14, %s39_s11  }
  0x1f   : > { %s181_s5 = scalar_lea.hbm %s1484_s0, %s980_s28  ;;  %s184_s8 = sshll.u32 %s176_s7, 4  ;;  %s185_s8 = int_to_ptr.vmem [resolvable:$true] %s184_s8 }
  0x20   : > { %s182_s6 = sshll.u32 %s181_s5, 4  ;;  %p1018_p2 = pnand %p1027_p3, %p1372_p5  ;;  %s183_s6 = int_to_ptr.hbm [resolvable:$true] %s182_s6 }
  0x21   : > { %s173_s21 = scalar_lea.sflag [#allocation4], %s172_s25  ;;  %s1270_s9 = smov 128  }
  0x22   : > { %s1271_s1 = smov 8   ;;  %196 = sbr.rel (%p1352_p8) target bundleno = 260 (0x104), region = 32 }
  0x23   : > { %1020 = dma.hbm_to_vmem [thread:$0]  (!%p1018_p2), %s183_s6, 256, %s185_s8, %s173_s21, %s1270_s9, %s1270_s9, %s1271_s1  }
  0x24   : > { %s1399_s11 = sand.u32 (!%p1352_p8), 1, %s1248_s13  }
  0x25   : > { %s941_s24 = sshll.u32 (!%p1352_p8), %s1399_s11, 4  ;;  %s199_s26 = scalar_lea.sflag (!%p1352_p8), [#allocation4], %s1399_s11 }
  0x26   : > { %s1403_s28 = scalar_lea.vmem (!%p1352_p8), [#allocation3], %s941_s24 }
  0x27   : > { %1231 = dma.done.wait (%p1339_p4), %s199_s26, 256  }
  0x28   : > { %1233 = vsyncadd (%p1339_p4), %s199_s26, 4294967040 }
  0x29   : > { %1235 = dma.done.wait (%p1329_p1), [#allocation7], 14368  }
  0x2a   : > { %1237 = vsyncadd (%p1329_p1), [#allocation7], 4294952928  ;;  %vm257_vm0 = vcmask 518144   ;;  %v1272_v0 = vmov 0.0   ;;  %v308_v1 = vld [vmem:[#allocation6 + $0xf0] sm:$0xff]  ;;  %v309_v2 = vld [vmem:[#allocation6 + $0xf8] sm:$0xff] }
  0x2b   : > { %258 = vst.msk [vmem:[#allocation2] sm:$0x7] %vm257_vm0, %v1272_v0  ;;  %v289_v3 = vld [vmem:[#allocation6 + $0x70] sm:$0xff]  ;;  %324 = vmatpush.msra.mxu0 %v308_v1  ;;  %347 = vmatpush.msra.mxu1 %v309_v2  ;;  %v290_v4 = vld [vmem:[#allocation6 + $0x78] sm:$0xff]  ;;  %v306_v5 = vld [vmem:[#allocation6 + $0xe0] sm:$0xff]  ;;  %vm241_vm1 = vcmask 523264  }
  0x2c   : > { %272 = vst.msk [vmem:[#allocation2 + $0x13] sm:$0x7] %vm257_vm0, %v1272_v0  ;;  %v307_v6 = vld [vmem:[#allocation6 + $0xe8] sm:$0xff]  ;;  %376 = vmatpush.msra.mxu2 %v289_v3  ;;  %399 = vmatpush.msra.mxu3 %v290_v4  ;;  %v287_v7 = vld [vmem:[#allocation6 + $0x60] sm:$0xff]  ;;  %v304_v9 = vld [vmem:[#allocation6 + $0xd0] sm:$0xff]  ;;  %s944_s1 = sshll.u32 %s1399_s11, 5 }
  0x2d   : > { %v288_v8 = vld [vmem:[#allocation6 + $0x68] sm:$0xff]  ;;  %325 = vmatpush.msra.mxu0 %v306_v5  ;;  %348 = vmatpush.msra.mxu1 %v307_v6  ;;  %v305_v10 = vld [vmem:[#allocation6 + $0xd8] sm:$0xff]  ;;  %v285_v11 = vld [vmem:[#allocation6 + $0x50] sm:$0xff]  ;;  %s981_s20 = sshll.u32 %s1256_s15, 5  ;;  %s235_s25 = scalar_lea.vmem [#allocation9], %s944_s1 }
  0x2e   : > { %v286_v12 = vld [vmem:[#allocation6 + $0x58] sm:$0xff]  ;;  %377 = vmatpush.msra.mxu2 %v287_v7  ;;  %400 = vmatpush.msra.mxu3 %v288_v8  ;;  %v302_v13 = vld [vmem:[#allocation6 + $0xc0] sm:$0xff]  ;;  %v303_v14 = vld [vmem:[#allocation6 + $0xc8] sm:$0xff]  ;;  %s818_s18 = scalar_lea.hbm %s1487_s3, %s981_s20  ;;  %s819_s30 = sshll.u32 %s235_s25, 4  ;;  %s820_s30 = int_to_ptr.vmem [resolvable:$true] %s819_s30 }
  0x2f   : > { %326 = vmatpush.msra.mxu0 %v304_v9  ;;  %349 = vmatpush.msra.mxu1 %v305_v10  ;;  %v283_v15 = vld [vmem:[#allocation6 + $0x40] sm:$0xff]  ;;  %v284_v16 = vld [vmem:[#allocation6 + $0x48] sm:$0xff]  ;;  %v300_v17 = vld [vmem:[#allocation6 + $0xb0] sm:$0xff]  ;;  %s821_s15 = sshll.u32 %s818_s18, 4  ;;  %s804_s4 = scalar_lea.sflag [#allocation5], %s1399_s11  ;;  %s822_s15 = int_to_ptr.hbm [resolvable:$true] %s821_s15 }
  0x30   : > { %378 = vmatpush.msra.mxu2 %v285_v11  ;;  %401 = vmatpush.msra.mxu3 %v286_v12  ;;  %v301_v18 = vld [vmem:[#allocation6 + $0xb8] sm:$0xff]  ;;  %v281_v19 = vld [vmem:[#allocation6 + $0x30] sm:$0xff]  ;;  %v298_v21 = vld [vmem:[#allocation6 + $0xa0] sm:$0xff]  ;;  %s1192_s5 = sshra.s32 %s822_s15, 4  ;;  %s1198_s21 = scalar_lea.hbm %s1487_s3, 64  ;;  %s1193_s5 = int_to_ptr.hbm [resolvable:$true] %s1192_s5 }
  0x31   : > { %327 = vmatpush.msra.mxu0 %v302_v13  ;;  %350 = vmatpush.msra.mxu1 %v303_v14  ;;  %v282_v20 = vld [vmem:[#allocation6 + $0x38] sm:$0xff]  ;;  %v299_v22 = vld [vmem:[#allocation6 + $0xa8] sm:$0xff]  ;;  %v279_v23 = vld [vmem:[#allocation6 + $0x20] sm:$0xff]  ;;  %s1194_s6 = scalar_lea.hbm %s1193_s5, 32  ;;  %p1199_p10 = scmp.lt.s32.totalorder %s1193_s5, %s1487_s3 }
  0x32   : > { %379 = vmatpush.msra.mxu2 %v283_v15  ;;  %402 = vmatpush.msra.mxu3 %v284_v16  ;;  %v280_v24 = vld [vmem:[#allocation6 + $0x28] sm:$0xff]  ;;  %v296_v25 = vld [vmem:[#allocation6 + $0x90] sm:$0xff]  ;;  %v297_v26 = vld [vmem:[#allocation6 + $0x98] sm:$0xff]  ;;  %p1195_p1 = scmp.ne.s32.totalorder %s1193_s5, %s1194_s6  ;;  %p1200_p12 = scmp.lt.s32.totalorder %s1198_s21, %s1194_s6 }
  0x33   : > { %328 = vmatpush.msra.mxu0 %v300_v17  ;;  %351 = vmatpush.msra.mxu1 %v301_v18  ;;  %v239_v27 = vld [vmem:[%s1403_s28] sm:$0xff]  ;;  %v278_v29 = vld [vmem:[#allocation6 + $0x18] sm:$0xff]  ;;  %v295_v31 = vld [vmem:[#allocation6 + $0x88] sm:$0xff] }
  0x34   : > { %380 = vmatpush.msra.mxu2 %v281_v19  ;;  %403 = vmatpush.msra.mxu3 %v282_v20  ;;  %v277_v28 = vld [vmem:[#allocation6 + $0x10] sm:$0xff]  ;;  %242 = vst.msk [vmem:[#allocation2 + $0x3] sm:$0xff] %vm241_vm1, %v239_v27  ;;  %v294_v30 = vld [vmem:[#allocation6 + $0x80] sm:$0xff]  ;;  %v276_v33 = vld [vmem:[#allocation6 + $0x8] sm:$0xff]  ;;  %p1196_p4 = pnand %p1195_p1, %p1378_p7  ;;  %p1201_p13 = por %p1200_p12, %p1199_p10 }
  0x35   : > { %329 = vmatpush.msra.mxu0 %v298_v21  ;;  %352 = vmatpush.msra.mxu1 %v299_v22  ;;  %v275_v32 = vld [vmem:[#allocation6] sm:$0xff]  ;;  %v506_v34 = vld [vmem:[#allocation6 + $0x1f0] sm:$0xff]  ;;  %v507_v35 = vld [vmem:[#allocation6 + $0x1f8] sm:$0xff] }
  0x36   : > { %381 = vmatpush.msra.mxu2 %v279_v23  ;;  %404 = vmatpush.msra.mxu3 %v280_v24  ;;  %v431_v36 = vld [vmem:[#allocation6 + $0x170] sm:$0xff]  ;;  %v432_v37 = vld [vmem:[#allocation6 + $0x178] sm:$0xff]  ;;  %v504_v39 = vld [vmem:[#allocation6 + $0x1e0] sm:$0xff]  ;;  %p1197_p8 = pneg %p1196_p4 }
  0x37   : > { %330 = vmatpush.msra.mxu0 %v296_v25  ;;  %353 = vmatpush.msra.mxu1 %v297_v26  ;;  %v240_v38 = vld [vmem:[%s1403_s28 + $0x8] sm:$0xff]  ;;  %v429_v43 = vld [vmem:[#allocation6 + $0x160] sm:$0xff]  ;;  %v502_v45 = vld [vmem:[#allocation6 + $0x1d0] sm:$0xff] }
  0x38   : > { %382 = vmatpush.msra.mxu2 %v277_v28  ;;  %405 = vmatpush.msra.mxu3 %v278_v29  ;;  %243 = vst.msk [vmem:[#allocation2 + $0xb] sm:$0xff] %vm241_vm1, %v240_v38  ;;  %v505_v42 = vld [vmem:[#allocation6 + $0x1e8] sm:$0xff]  ;;  %v503_v46 = vld [vmem:[#allocation6 + $0x1d8] sm:$0xff]  ;;  %v427_v47 = vld [vmem:[#allocation6 + $0x150] sm:$0xff]  ;;  %p1202_p0 = pnand %p1201_p13, %p1197_p8 }
  0x39   : > { %331 = vmatpush.msra.mxu0 %v294_v30  ;;  %354 = vmatpush.msra.mxu1 %v295_v31  ;;  %v430_v44 = vld [vmem:[#allocation6 + $0x168] sm:$0xff]  ;;  %v428_v48 = vld [vmem:[#allocation6 + $0x158] sm:$0xff]  ;;  %v500_v49 = vld [vmem:[#allocation6 + $0x1c0] sm:$0xff] }
  0x3a   : > { %383 = vmatpush.msra.mxu2 %v275_v32  ;;  %406 = vmatpush.msra.mxu3 %v276_v33  ;;  %v501_v50 = vld [vmem:[#allocation6 + $0x1c8] sm:$0xff]  ;;  %v425_v51 = vld [vmem:[#allocation6 + $0x140] sm:$0xff]  ;;  %v498_v55 = vld [vmem:[#allocation6 + $0x1b0] sm:$0xff] }
  0x3b   : > { %v291_v40 = vld [vmem:[#allocation2 + $0x1] sm:$0xff]  ;;  %447 = vmatpush.msrb.mxu0 %v431_v36  ;;  %470 = vmatpush.msrb.mxu1 %v432_v37  ;;  %v499_v56 = vld [vmem:[#allocation6 + $0x1b8] sm:$0xff]  ;;  %v496_v59 = vld [vmem:[#allocation6 + $0x1a0] sm:$0xff] }
  0x3c   : > { %522 = vmatpush.msrb.mxu2 %v506_v34  ;;  %545 = vmatpush.msrb.mxu3 %v507_v35  ;;  %v273_v41 = vld [vmem:[#allocation2] sm:$0xff]  ;;  %v423_v57 = vld [vmem:[#allocation6 + $0x130] sm:$0xff]  ;;  %v424_v58 = vld [vmem:[#allocation6 + $0x138] sm:$0xff] }
  0x3d   : > { %947 = vmatmul.msk.f32.vlgmr.msra.gmra.mxu0 %vm241_vm1, %v291_v40  ;;  %949 = vmatmul.msk.f32.vlgmr.msra.gmra.mxu1 %vm241_vm1, %v291_v40  ;;  %v426_v52 = vld [vmem:[#allocation6 + $0x148] sm:$0xff]  ;;  %v421_v61 = vld [vmem:[#allocation6 + $0x120] sm:$0xff]  ;;  %v494_v63 = vld [vmem:[#allocation6 + $0x190] sm:$0xff] }
  0x3e   : > { %951 = vmatmul.msk.f32.vlgmr.msra.gmra.mxu2 %vm241_vm1, %v273_v41  ;;  %953 = vmatmul.msk.f32.vlgmr.msra.gmra.mxu3 %vm241_vm1, %v273_v41  ;;  %v497_v60 = vld [vmem:[#allocation6 + $0x1a8] sm:$0xff]  ;;  %v495_v0 = vld [vmem:[#allocation6 + $0x198] sm:$0xff]  ;;  %v419_v1 = vld [vmem:[#allocation6 + $0x110] sm:$0xff] }
  0x3f   : > { %523 = vmatpush.msrb.mxu2 %v504_v39  ;;  %546 = vmatpush.msrb.mxu3 %v505_v42  ;;  %v292_v53 = vld [vmem:[#allocation2 + $0x9] sm:$0xff]  ;;  %v422_v62 = vld [vmem:[#allocation6 + $0x128] sm:$0xff]  ;;  %v492_v3 = vld [vmem:[#allocation6 + $0x180] sm:$0xff] }
  0x40   : > { %448 = vmatpush.msrb.mxu0 %v429_v43  ;;  %471 = vmatpush.msrb.mxu1 %v430_v44  ;;  %v274_v54 = vld [vmem:[#allocation2 + $0x8] sm:$0xff]  ;;  %v420_v2 = vld [vmem:[#allocation6 + $0x118] sm:$0xff]  ;;  %v493_v4 = vld [vmem:[#allocation6 + $0x188] sm:$0xff] }
  0x41   : > { %524 = vmatpush.msrb.mxu2 %v502_v45  ;;  %547 = vmatpush.msrb.mxu3 %v503_v46  ;;  %v417_v5 = vld [vmem:[#allocation6 + $0x100] sm:$0xff]  ;;  %v418_v6 = vld [vmem:[#allocation6 + $0x108] sm:$0xff]  ;;  %v656_v9 = vld [vmem:[#allocation6 + $0x2f0] sm:$0xff] }
  0x42   : > { %449 = vmatpush.msrb.mxu0 %v427_v47  ;;  %472 = vmatpush.msrb.mxu1 %v428_v48  ;;  %v414_v7 = vld [vmem:[#allocation2 + $0x2] sm:$0xff]  ;;  %v657_v10 = vld [vmem:[#allocation6 + $0x2f8] sm:$0xff]  ;;  %v654_v13 = vld [vmem:[#allocation6 + $0x2e0] sm:$0xff] }
  0x43   : > { %525 = vmatpush.msrb.mxu2 %v500_v49  ;;  %548 = vmatpush.msrb.mxu3 %v501_v50  ;;  %v489_v8 = vld [vmem:[#allocation2 + $0x3] sm:$0xff]  ;;  %v582_v12 = vld [vmem:[#allocation6 + $0x278] sm:$0xff]  ;;  %v579_v15 = vld [vmem:[#allocation6 + $0x260] sm:$0xff] }
  0x44   : > { %450 = vmatpush.msrb.mxu0 %v425_v51  ;;  %473 = vmatpush.msrb.mxu1 %v426_v52  ;;  %v581_v11 = vld [vmem:[#allocation6 + $0x270] sm:$0xff]  ;;  %v655_v14 = vld [vmem:[#allocation6 + $0x2e8] sm:$0xff]  ;;  %v653_v18 = vld [vmem:[#allocation6 + $0x2d8] sm:$0xff] }
  0x45   : > { %948 = vmatmul.msk.f32.gmra.mxu0 %vm241_vm1, %v292_v53  ;;  %950 = vmatmul.msk.f32.gmra.mxu1 %vm241_vm1, %v292_v53  ;;  %v580_v16 = vld [vmem:[#allocation6 + $0x268] sm:$0xff]  ;;  %v652_v17 = vld [vmem:[#allocation6 + $0x2d0] sm:$0xff]  ;;  %v578_v20 = vld [vmem:[#allocation6 + $0x258] sm:$0xff] }
  0x46   : > { %952 = vmatmul.msk.f32.gmra.mxu2 %vm241_vm1, %v274_v54  ;;  %954 = vmatmul.msk.f32.gmra.mxu3 %vm241_vm1, %v274_v54  ;;  %v577_v19 = vld [vmem:[#allocation6 + $0x250] sm:$0xff]  ;;  %v650_v21 = vld [vmem:[#allocation6 + $0x2c0] sm:$0xff]  ;;  %v651_v22 = vld [vmem:[#allocation6 + $0x2c8] sm:$0xff] }
  0x47   : > { %526 = vmatpush.msrb.mxu2 %v498_v55  ;;  %549 = vmatpush.msrb.mxu3 %v499_v56  ;;  %v575_v23 = vld [vmem:[#allocation6 + $0x240] sm:$0xff]  ;;  %v576_v24 = vld [vmem:[#allocation6 + $0x248] sm:$0xff]  ;;  %v415_v25 = vld [vmem:[#allocation2 + $0xa] sm:$0xff] }
  0x48   : > { %451 = vmatpush.msrb.mxu0 %v423_v57  ;;  %474 = vmatpush.msrb.mxu1 %v424_v58  ;;  %v490_v26 = vld [vmem:[#allocation2 + $0xb] sm:$0xff]  ;;  %v646_v31 = vld [vmem:[#allocation6 + $0x2a0] sm:$0xff]  ;;  %v647_v32 = vld [vmem:[#allocation6 + $0x2a8] sm:$0xff] }
  0x49   : > { %527 = vmatpush.msrb.mxu2 %v496_v59  ;;  %550 = vmatpush.msrb.mxu3 %v497_v60  ;;  %v648_v27 = vld [vmem:[#allocation6 + $0x2b0] sm:$0xff]  ;;  %v649_v28 = vld [vmem:[#allocation6 + $0x2b8] sm:$0xff]  ;;  %v571_v33 = vld [vmem:[#allocation6 + $0x220] sm:$0xff] }
  0x4a   : > { %452 = vmatpush.msrb.mxu0 %v421_v61  ;;  %475 = vmatpush.msrb.mxu1 %v422_v62  ;;  %v573_v29 = vld [vmem:[#allocation6 + $0x230] sm:$0xff]  ;;  %v574_v30 = vld [vmem:[#allocation6 + $0x238] sm:$0xff]  ;;  %v572_v34 = vld [vmem:[#allocation6 + $0x228] sm:$0xff] }
  0x4b   : > { %528 = vmatpush.msrb.mxu2 %v494_v63  ;;  %551 = vmatpush.msrb.mxu3 %v495_v0  ;;  %v644_v35 = vld [vmem:[#allocation6 + $0x290] sm:$0xff]  ;;  %v645_v36 = vld [vmem:[#allocation6 + $0x298] sm:$0xff]  ;;  %v642_v39 = vld [vmem:[#allocation6 + $0x280] sm:$0xff] }
  0x4c   : > { %453 = vmatpush.msrb.mxu0 %v419_v1  ;;  %476 = vmatpush.msrb.mxu1 %v420_v2  ;;  %v569_v37 = vld [vmem:[#allocation6 + $0x210] sm:$0xff]  ;;  %v570_v38 = vld [vmem:[#allocation6 + $0x218] sm:$0xff]  ;;  %v643_v40 = vld [vmem:[#allocation6 + $0x288] sm:$0xff] }
  0x4d   : > { %529 = vmatpush.msrb.mxu2 %v492_v3  ;;  %552 = vmatpush.msrb.mxu3 %v493_v4  ;;  %v567_v41 = vld [vmem:[#allocation6 + $0x200] sm:$0xff]  ;;  %v568_v42 = vld [vmem:[#allocation6 + $0x208] sm:$0xff]  ;;  %v731_v45 = vld [vmem:[#allocation6 + $0x370] sm:$0xff] }
  0x4e   : > { %454 = vmatpush.msrb.mxu0 %v417_v5  ;;  %477 = vmatpush.msrb.mxu1 %v418_v6  ;;  %v564_v43 = vld [vmem:[#allocation2 + $0x4] sm:$0xff]  ;;  %v732_v46 = vld [vmem:[#allocation6 + $0x378] sm:$0xff]  ;;  %v729_v47 = vld [vmem:[#allocation6 + $0x360] sm:$0xff] }
  0x4f   : > { %955 = vmatmul.msk.f32.vlgmr.msrb.gmra.mxu0 %vm241_vm1, %v414_v7  ;;  %957 = vmatmul.msk.f32.vlgmr.msrb.gmra.mxu1 %vm241_vm1, %v414_v7  ;;  %v639_v44 = vld [vmem:[#allocation2 + $0x5] sm:$0xff]  ;;  %v728_v50 = vld [vmem:[#allocation6 + $0x358] sm:$0xff]  ;;  %v725_v51 = vld [vmem:[#allocation6 + $0x340] sm:$0xff] }
  0x50   : > { %959 = vmatmul.msk.f32.vlgmr.msrb.gmra.mxu2 %vm241_vm1, %v489_v8  ;;  %961 = vmatmul.msk.f32.vlgmr.msrb.gmra.mxu3 %vm241_vm1, %v489_v8  ;;  %v730_v48 = vld [vmem:[#allocation6 + $0x368] sm:$0xff]  ;;  %v727_v49 = vld [vmem:[#allocation6 + $0x350] sm:$0xff]  ;;  %v724_v56 = vld [vmem:[#allocation6 + $0x338] sm:$0xff] }
  0x51   : > { %672 = vmatpush.msra.mxu2 %v656_v9  ;;  %695 = vmatpush.msra.mxu3 %v657_v10  ;;  %v726_v52 = vld [vmem:[#allocation6 + $0x348] sm:$0xff]  ;;  %v565_v53 = vld [vmem:[#allocation2 + $0xc] sm:$0xff]  ;;  %v721_v57 = vld [vmem:[#allocation6 + $0x320] sm:$0xff] }
  0x52   : > { %597 = vmatpush.msra.mxu0 %v581_v11  ;;  %620 = vmatpush.msra.mxu1 %v582_v12  ;;  %v640_v54 = vld [vmem:[#allocation2 + $0xd] sm:$0xff]  ;;  %v722_v58 = vld [vmem:[#allocation6 + $0x328] sm:$0xff]  ;;  %v717_v61 = vld [vmem:[#allocation6 + $0x300] sm:$0xff] }
  0x53   : > { %673 = vmatpush.msra.mxu2 %v654_v13  ;;  %696 = vmatpush.msra.mxu3 %v655_v14  ;;  %v723_v55 = vld [vmem:[#allocation6 + $0x330] sm:$0xff]  ;;  %v720_v60 = vld [vmem:[#allocation6 + $0x318] sm:$0xff]  ;;  %v718_v62 = vld [vmem:[#allocation6 + $0x308] sm:$0xff] }
  0x54   : > { %598 = vmatpush.msra.mxu0 %v579_v15  ;;  %621 = vmatpush.msra.mxu1 %v580_v16  ;;  %v719_v59 = vld [vmem:[#allocation6 + $0x310] sm:$0xff] }
  0x55   : > { %674 = vmatpush.msra.mxu2 %v652_v17  ;;  %697 = vmatpush.msra.mxu3 %v653_v18  ;;  %v714_v63 = vld [vmem:[#allocation2 + $0x6] sm:$0xff]  ;;  %v715_v0 = vld [vmem:[#allocation2 + $0xe] sm:$0xff] }
  0x56   : > { %599 = vmatpush.msra.mxu0 %v577_v19  ;;  %622 = vmatpush.msra.mxu1 %v578_v20 }
  0x57   : > { %675 = vmatpush.msra.mxu2 %v650_v21  ;;  %698 = vmatpush.msra.mxu3 %v651_v22 }
  0x58   : > { %600 = vmatpush.msra.mxu0 %v575_v23  ;;  %623 = vmatpush.msra.mxu1 %v576_v24 }
  0x59   : > { %956 = vmatmul.msk.f32.gmra.mxu0 %vm241_vm1, %v415_v25  ;;  %958 = vmatmul.msk.f32.gmra.mxu1 %vm241_vm1, %v415_v25 }
  0x5a   : > { %960 = vmatmul.msk.f32.gmra.mxu2 %vm241_vm1, %v490_v26  ;;  %962 = vmatmul.msk.f32.gmra.mxu3 %vm241_vm1, %v490_v26 }
  0x5b   : > { %676 = vmatpush.msra.mxu2 %v648_v27  ;;  %699 = vmatpush.msra.mxu3 %v649_v28 }
  0x5c   : > { %601 = vmatpush.msra.mxu0 %v573_v29  ;;  %624 = vmatpush.msra.mxu1 %v574_v30  ;;  %v789_v29 = vld [vmem:[#allocation8] sm:$0x3] }
  0x5d   : > { %677 = vmatpush.msra.mxu2 %v646_v31  ;;  %700 = vmatpush.msra.mxu3 %v647_v32 }
  0x5e   : > { %602 = vmatpush.msra.mxu0 %v571_v33  ;;  %625 = vmatpush.msra.mxu1 %v572_v34 }
  0x5f   : > { %678 = vmatpush.msra.mxu2 %v644_v35  ;;  %701 = vmatpush.msra.mxu3 %v645_v36 }
  0x60   : > { %603 = vmatpush.msra.mxu0 %v569_v37  ;;  %626 = vmatpush.msra.mxu1 %v570_v38  ;;  %v791_v38 = vperm.slane %v789_v29, 0 }
  0x61   : > { %679 = vmatpush.msra.mxu2 %v642_v39  ;;  %702 = vmatpush.msra.mxu3 %v643_v40 }
  0x62   : > { %604 = vmatpush.msra.mxu0 %v567_v41  ;;  %627 = vmatpush.msra.mxu1 %v568_v42  ;;  %v792_v42 = vperm.slane %v789_v29, 1 }
  0x63   : > { %963 = vmatmul.msk.f32.vlgmr.msra.gmra.mxu0 %vm241_vm1, %v564_v43  ;;  %965 = vmatmul.msk.f32.vlgmr.msra.gmra.mxu1 %vm241_vm1, %v564_v43 }
  0x64   : > { %967 = vmatmul.msk.f32.vlgmr.msra.gmra.mxu2 %vm241_vm1, %v639_v44  ;;  %969 = vmatmul.msk.f32.vlgmr.msra.gmra.mxu3 %vm241_vm1, %v639_v44 }
  0x65   : > { %982 = vmatpush.msrb.mxu2 %v731_v45  ;;  %990 = vmatpush.msrb.mxu3 %v732_v46 }
  0x66   : > { %747 = vmatpush.msrb.mxu0 %v731_v45  ;;  %770 = vmatpush.msrb.mxu1 %v732_v46 }
  0x67   : > { %983 = vmatpush.msrb.mxu2 %v729_v47  ;;  %991 = vmatpush.msrb.mxu3 %v730_v48 }
  0x68   : > { %748 = vmatpush.msrb.mxu0 %v729_v47  ;;  %771 = vmatpush.msrb.mxu1 %v730_v48 }
  0x69   : > { %984 = vmatpush.msrb.mxu2 %v727_v49  ;;  %992 = vmatpush.msrb.mxu3 %v728_v50 }
  0x6a   : > { %749 = vmatpush.msrb.mxu0 %v727_v49  ;;  %772 = vmatpush.msrb.mxu1 %v728_v50 }
  0x6b   : > { %985 = vmatpush.msrb.mxu2 %v725_v51  ;;  %993 = vmatpush.msrb.mxu3 %v726_v52 }
  0x6c   : > { %750 = vmatpush.msrb.mxu0 %v725_v51  ;;  %773 = vmatpush.msrb.mxu1 %v726_v52 }
  0x6d   : > { %964 = vmatmul.msk.f32.gmra.mxu0 %vm241_vm1, %v565_v53  ;;  %966 = vmatmul.msk.f32.gmra.mxu1 %vm241_vm1, %v565_v53 }
  0x6e   : > { %968 = vmatmul.msk.f32.gmra.mxu2 %vm241_vm1, %v640_v54  ;;  %970 = vmatmul.msk.f32.gmra.mxu3 %vm241_vm1, %v640_v54 }
  0x6f   : > { %986 = vmatpush.msrb.mxu2 %v723_v55  ;;  %994 = vmatpush.msrb.mxu3 %v724_v56 }
  0x70   : > { %751 = vmatpush.msrb.mxu0 %v723_v55  ;;  %774 = vmatpush.msrb.mxu1 %v724_v56 }
  0x71   : > { %987 = vmatpush.msrb.mxu2 %v721_v57  ;;  %995 = vmatpush.msrb.mxu3 %v722_v58 }
  0x72   : > { %752 = vmatpush.msrb.mxu0 %v721_v57  ;;  %775 = vmatpush.msrb.mxu1 %v722_v58 }
  0x73   : > { %988 = vmatpush.msrb.mxu2 %v719_v59  ;;  %996 = vmatpush.msrb.mxu3 %v720_v60 }
  0x74   : > { %753 = vmatpush.msrb.mxu0 %v719_v59  ;;  %776 = vmatpush.msrb.mxu1 %v720_v60 }
  0x75   : > { %989 = vmatpush.msrb.mxu2 %v717_v61  ;;  %997 = vmatpush.msrb.mxu3 %v718_v62 }
  0x76   : > { %754 = vmatpush.msrb.mxu0 %v717_v61  ;;  %777 = vmatpush.msrb.mxu1 %v718_v62 }
  0x77   : > { %971 = vmatmul.msk.f32.vlgmr.msrb.gmra.mxu0 %vm241_vm1, %v714_v63  ;;  %972 = vmatmul.msk.f32.vlgmr.msrb.gmra.mxu2 %vm241_vm1, %v715_v0 }
  0x78   : > { %973 = vmatmul.msk.f32.vlgmr.msrb.gmra.mxu1 %vm241_vm1, %v714_v63  ;;  %974 = vmatmul.msk.f32.vlgmr.msrb.gmra.mxu3 %vm241_vm1, %v715_v0 }
  0xba   : > { %v333_v1 = vpop.f32.mrf.mxu0  ;;  %v356_v2 = vpop.f32.mrf.mxu1 }
  0xc1   : > { %v385_v3 = vpop.f32.mrf.mxu2  ;;  %v408_v4 = vpop.f32.mrf.mxu3 }
  0xc2   : > { %v336_v5 = vpop.f32.mrf.mxu0  ;;  %v359_v6 = vpop.f32.mrf.mxu1  ;;  %v386_v22 = vadd.f32 %v385_v3, %v333_v1  ;;  %v409_v24 = vadd.f32 %v408_v4, %v356_v2 }
  0xc9   : > { %v388_v7 = vpop.f32.mrf.mxu2  ;;  %v411_v8 = vpop.f32.mrf.mxu3 }
  0xca   : > { %v389_v30 = vadd.f32 %v388_v7, %v336_v5  ;;  %v412_v34 = vadd.f32 %v411_v8, %v359_v6 }
  0xcc   : > { %v456_v9 = vpop.f32.mrf.mxu0  ;;  %v479_v10 = vpop.f32.mrf.mxu1 }
  0xcd   : > { %v485_v25 = vadd.f32 %v456_v9, %v386_v22  ;;  %v486_v26 = vadd.f32 %v479_v10, %v409_v24 }
  0xd3   : > { %v531_v11 = vpop.f32.mrf.mxu2  ;;  %v554_v12 = vpop.f32.mrf.mxu3 }
  0xd4   : > { %v560_v27 = vadd.f32 %v531_v11, %v485_v25  ;;  %v561_v28 = vadd.f32 %v554_v12, %v486_v26 }
  0xd6   : > { %v459_v13 = vpop.f32.mrf.mxu0  ;;  %v482_v14 = vpop.f32.mrf.mxu1 }
  0xd7   : > { %v487_v36 = vadd.f32 %v459_v13, %v389_v30  ;;  %v488_v39 = vadd.f32 %v482_v14, %v412_v34 }
  0xdd   : > { %v534_v15 = vpop.f32.mrf.mxu2  ;;  %v557_v16 = vpop.f32.mrf.mxu3 }
  0xde   : > { %v562_v43 = vadd.f32 %v534_v15, %v487_v36  ;;  %v563_v46 = vadd.f32 %v557_v16, %v488_v39 }
  0xe0   : > { %v606_v17 = vpop.f32.mrf.mxu0  ;;  %v629_v18 = vpop.f32.mrf.mxu1 }
  0xe1   : > { %v635_v31 = vadd.f32 %v606_v17, %v560_v27  ;;  %v636_v35 = vadd.f32 %v629_v18, %v561_v28 }
  0xe7   : > { %v681_v19 = vpop.f32.mrf.mxu2  ;;  %v704_v20 = vpop.f32.mrf.mxu3 }
  0xe8   : > { %v710_v37 = vadd.f32 %v681_v19, %v635_v31  ;;  %v711_v40 = vadd.f32 %v704_v20, %v636_v35 }
  0xea   : > { %v609_v21 = vpop.f32.mrf.mxu0  ;;  %v632_v23 = vpop.f32.mrf.mxu1 }
  0xeb   : > { %v637_v48 = vadd.f32 %v609_v21, %v562_v43  ;;  %v638_v50 = vadd.f32 %v632_v23, %v563_v46 }
  0xf1   : > { %v684_v32 = vpop.f32.mrf.mxu2  ;;  %v707_v33 = vpop.f32.mrf.mxu3 }
  0xf2   : > { %v712_v52 = vadd.f32 %v684_v32, %v637_v48  ;;  %v713_v53 = vadd.f32 %v707_v33, %v638_v50 }
  0xf4   : > { %v756_v41 = vpop.f32.mrf.mxu0 }
  0xf5   : > { %v785_v44 = vadd.f32 %v756_v41, %v710_v37  ;;  %v779_v45 = vpop.f32.mrf.mxu1 }
  0xf6   : > { %v786_v47 = vadd.f32 %v779_v45, %v711_v40 }
  0xf7   : > { %v795_v49 = vadd.f32 %v791_v38, %v785_v44 }
  0xf8   : > { %v796_v51 = vadd.f32 %v792_v42, %v786_v47 }
  0xf9   : > { %799 = vst [vmem:[%s235_s25] sm:$0xff] %v795_v49 }
  0xfa   : > { %800 = vst [vmem:[%s235_s25 + $0x8] sm:$0xff] %v796_v51  ;;  %v759_v54 = vpop.f32.mrf.mxu2 }
  0xfb   : > { %v787_v55 = vadd.f32 %v759_v54, %v712_v52  ;;  %v782_v56 = vpop.f32.mrf.mxu3 }
  0xfc   : > { %v788_v57 = vadd.f32 %v782_v56, %v713_v53 }
  0xfd   : > { %v797_v58 = vadd.f32 %v791_v38, %v787_v55 }
  0xfe   : > { %v798_v59 = vadd.f32 %v792_v42, %v788_v57 }
  0xff   : > { %801 = vst [vmem:[%s235_s25 + $0x10] sm:$0xff] %v797_v58 }
 0x100   : > { %802 = vst [vmem:[%s235_s25 + $0x18] sm:$0xff] %v798_v59 }
 0x101   : > { %1205 = shalt.err (!%p1202_p0)
}
 0x102   : > { %s1273_s11 = smov 256   ;;  %s1274_s26 = smov 16  }
 0x103   : > { %1008 = dma.vmem_to_hbm [thread:$0]  (%p1378_p7), %s820_s30, 512, %s822_s15, %s804_s4, %s1273_s11, %s1273_s11, %s1274_s26  }
 0x104 PF: > { %s836_s28 = sand.u32 1, %s1244_s12   ;;  %p1022_p3 = pnand %p936_p11, %p1344_p6 }
 0x105   : > { %s837_s1 = scalar_lea.sflag [#allocation5], %s836_s28 }
 0x106   : > { %p1023_p5 = pneg %p1022_p3 }
 0x108   : > { %1239 = dma.done.wait (%p1023_p5), %s837_s1, 512  }
 0x109   : > { %1241 = vsyncadd (%p1023_p5), %s837_s1, 4294966784  ;;  %s20_s17 = sadd.s32 1, %s1264_s17   ;;  %s1497_s12 = smov %s1248_s13 }
 0x10a   : > { %p17_p9 = scmp.ge.s32.totalorder %s20_s17, 4   ;;  %s1498_s13 = smov %s1252_s14 }
 0x10b   : > { %s1499_s14 = smov %s1387_s29  ;;  %s1500_s15 = smov %s1260_s16 }
 0x10c   : > { %s1501_s16 = smov %s1503_s10  ;;  %19 = sbr.rel (!%p17_p9) target bundleno = 9 (0x9), region = 110 }
 0x111   :  { %843 = vsyncpa [#allocation4], 1 }
 0x112   :  { %845 = vsyncpa [#allocation4 + $0x1], 1 }
 0x113   :  { %846 = vsyncpa [#allocation7], 1 }
 0x114   :  { %847 = vsyncpa [#allocation5], 1 }
 0x115   :  { %849 = vsyncpa [#allocation5 + $0x1], 1 }

</bundles_post_ra>
